<compile_context>
chip_gen: v6e
topology: v6e:2x2x1
jax: 0.10.0
libtpu: 0.0.40
codegen_flags: <defaults>
</compile_context>

<pallas_src>
import functools

import numpy as np

import jax
import jax.numpy as jnp
from jax.experimental import pallas as pl
from jax.experimental.pallas import tpu as pltpu

KH = KW = 3


def _tap_masks(H, W, dtype=jnp.float32):
    """Precompute the 9 zero-padding halo masks (static: depends only on H, W)."""
    HW = H * W
    f = np.arange(HW)
    row, col = f // W, f % W
    masks = np.empty((KH * KW, HW), dtype=np.float32)
    t = 0
    for kh in range(KH):
        for kw in range(KW):
            dh, dw = kh - 1, kw - 1
            masks[t] = (((row + dh) >= 0) & ((row + dh) < H) &
                        ((col + dw) >= 0) & ((col + dw) < W)).astype(np.float32)
            t += 1
    return jnp.asarray(masks, dtype=dtype)


def pack_conv_params(w_oihw, bias, H, W):
    """One-time parameter/constant prep, hoisted out of the per-call forward path."""
    Cout, Cin, kh, kw = w_oihw.shape
    assert (kh, kw) == (KH, KW)
    # (O, I, KH, KW) -> (KH*KW, Cout, Cin): one small (Cout, Cin) matrix per tap.
    w_taps = jnp.transpose(w_oihw, (2, 3, 0, 1)).reshape(KH * KW, Cout, Cin)
    w_taps = w_taps.astype(jnp.float32)
    b_col = bias.reshape(Cout, 1).astype(jnp.float32)
    masks = _tap_masks(H, W, jnp.float32)                     # (9, H*W)
    return w_taps, b_col, masks


def conv3x3_bias_relu_kernel(x_ref, w_ref, b_ref, m_ref, o_ref, *, H, W, NB):
    # x_ref: (NB, Cin, H*W)   batch tile; channels on sublanes, spatial on lanes
    # w_ref: (9, Cout, Cin)   per-tap weight matrices (resident)
    # b_ref: (Cout, 1)        bias (resident)
    # m_ref: (9, H*W)         precomputed halo masks (resident constants)
    # o_ref: (NB, Cout, H*W)
    HW = H * W
    bias = b_ref[...]                                          # (Cout, 1)

    for b in range(NB):                      # static unroll: whole batch tile in ONE grid step
        x = x_ref[b].astype(jnp.float32)                       # (Cin, HW)
        acc = None
        t = 0
        for kh in range(KH):
            for kw in range(KW):
                dh, dw = kh - 1, kw - 1
                s = dh * W + dw                                # flat spatial shift of this tap
                shifted = pltpu.roll(x, (-s) % HW, axis=1) if s != 0 else x
                tap = shifted * m_ref[pl.ds(t, 1), :]          # halo mask (precomputed)
                # Nine accumulating MXU dots (no 36-sublane concat relayout).
                contrib = jnp.dot(w_ref[t], tap,
                                  preferred_element_type=jnp.float32)  # (Cout, HW)
                acc = contrib if acc is None else acc + contrib
                t += 1
        acc = acc + bias
        o_ref[b] = jnp.maximum(acc, 0.0).astype(o_ref.dtype)


def _num_batch_blocks(N):
    # v7x has 2 TensorCores/chip sharing parallel grid axes: keep >= 2 blocks
    # there so both TCs get work.  Single-TC chips (v5e/v6e) do best with the
    # whole batch collapsed into one block (fewest grid steps / DMAs).
    if N <= 1:
        return 1
    try:
        kind = jax.devices()[0].device_kind.lower()
    except Exception:
        kind = ""
    return 2 if ("v7" in kind or "7x" in kind) else 1


def shared_module_forward(x_nchw, packed_params, *, num_batch_blocks=None):
    """SharedModule(inner, dynamic=...).forward(x) == inner(x)."""
    w_taps, b_col, masks = packed_params
    N, Cin, H, W = x_nchw.shape
    Cout = w_taps.shape[1]
    HW = H * W

    nb_blocks = (_num_batch_blocks(N)
                 if num_batch_blocks is None else num_batch_blocks)
    NB = -(-N // nb_blocks)                  # batch tile per grid step
    N_pad = NB * nb_blocks

    # Trailing-dim reshape only (no transpose, no spatial pad).
    x_flat = x_nchw.reshape(N, Cin, HW)
    if N_pad != N:
        x_flat = jnp.pad(x_flat, ((0, N_pad - N), (0, 0), (0, 0)))

    kernel = functools.partial(conv3x3_bias_relu_kernel, H=H, W=W, NB=NB)

    out_flat = pl.pallas_call(
        kernel,
        out_shape=jax.ShapeDtypeStruct((N_pad, Cout, HW), x_nchw.dtype),
        grid=(nb_blocks,),
        in_specs=[
            pl.BlockSpec((NB, Cin, HW), lambda g: (g, 0, 0)),        # batch tile
            pl.BlockSpec((KH * KW, Cout, Cin), lambda g: (0, 0, 0)), # weights (resident)
            pl.BlockSpec((Cout, 1), lambda g: (0, 0)),               # bias (resident)
            pl.BlockSpec((KH * KW, HW), lambda g: (0, 0)),           # halo masks (resident)
        ],
        out_specs=pl.BlockSpec((NB, Cout, HW), lambda g: (g, 0, 0)),
        compiler_params=pltpu.CompilerParams(
            dimension_semantics=("parallel",),        # batch-tile axis -> both v7x TCs
            vmem_limit_bytes=32 * 1024 * 1024,        # fits v7x's 64 MiB and v5e/v6e's 128 MiB
        ),
    )(x_flat, w_taps, b_col, masks)

    if N_pad != N:
        out_flat = out_flat[:N]
    return out_flat.reshape(N, Cout, H, W)


def reference_forward(x_nchw, w_oihw, bias):
    out = jax.lax.conv_general_dilated(
        x_nchw.astype(jnp.float32), w_oihw.astype(jnp.float32),
        window_strides=(1, 1), padding=((1, 1), (1, 1)),
        dimension_numbers=('NCHW', 'OIHW', 'NCHW'))
    out = out + bias[None, :, None, None]
    return jnp.maximum(out, 0.0)


if __name__ == "__main__":
    key = jax.random.PRNGKey(0)
    kx, kw, kb = jax.random.split(key, 3)

    N, Cin, H, W = 2, 4, 16, 16
    Cout = 8

    x = jax.random.normal(kx, (N, Cin, H, W), dtype=jnp.float32)
    # Deterministic parameter init (synthetic; not a checkpoint load).
    fan_in = Cin * KH * KW
    bound = 1.0 / (fan_in ** 0.5)
    w_oihw = jax.random.uniform(kw, (Cout, Cin, KH, KW),
                                minval=-bound, maxval=bound, dtype=jnp.float32)
    bias = jax.random.uniform(kb, (Cout,), minval=-bound, maxval=bound,
                              dtype=jnp.float32)

    # One-time parameter packing (hoisted out of the forward path).
    params = pack_conv_params(w_oihw, bias, H, W)

    out = jax.block_until_ready(shared_module_forward(x, params))
    ref = jax.block_until_ready(reference_forward(x, w_oihw, bias))

    assert out.shape == (N, Cout, H, W)
    assert jnp.allclose(out, ref, atol=1e-5, rtol=1e-5)

    print("KERNEL_OK")
</pallas_src>

<mosaic_0001>
module attributes {stable_mosaic.version = 11 : i64} {
  func.func @conv3x3_bias_relu_kernel(%arg0: i32, %arg1: memref<2x4x256xf32, #tpu.memory_space<vmem>>, %arg2: memref<9x8x4xf32, #tpu.memory_space<vmem>>, %arg3: memref<8x1xf32, #tpu.memory_space<vmem>>, %arg4: memref<9x256xf32, #tpu.memory_space<vmem>>, %arg5: memref<2x8x256xf32, #tpu.memory_space<vmem>>) attributes {dimension_semantics = [#tpu.dimension_semantics<parallel>], iteration_bounds = array<i64: 1>, scalar_prefetch = 0 : i64, scratch_operands = 0 : i64, tpu.core_type = #tpu.core_type<tc>, window_params = [{transform_indices = @transform_0, window_bounds = array<i64: 2, 4, 256>}, {pipeline_mode = #tpu.pipeline_mode<synchronous>, transform_indices = @transform_1, window_bounds = array<i64: 9, 8, 4>}, {pipeline_mode = #tpu.pipeline_mode<synchronous>, transform_indices = @transform_2, window_bounds = array<i64: 8, 1>}, {pipeline_mode = #tpu.pipeline_mode<synchronous>, transform_indices = @transform_3, window_bounds = array<i64: 9, 256>}, {transform_indices = @transform_4, window_bounds = array<i64: 2, 8, 256>}]} {
    %c0 = arith.constant 0 : index
    %c0_0 = arith.constant 0 : index
    %0 = vector.load %arg3[%c0, %c0_0] : memref<8x1xf32, #tpu.memory_space<vmem>>, vector<8x1xf32>
    %c0_1 = arith.constant 0 : index
    %c0_2 = arith.constant 0 : index
    %c0_3 = arith.constant 0 : index
    %1 = vector.load %arg1[%c0_1, %c0_2, %c0_3] : memref<2x4x256xf32, #tpu.memory_space<vmem>>, vector<1x4x256xf32>
    %2 = vector.shape_cast %1 : vector<1x4x256xf32> to vector<4x256xf32>
    %c17_i32 = arith.constant 17 : i32
    %3 = tpu.dynamic_rotate %2 by %c17_i32 dim 1 : vector<4x256xf32>, i32 -> vector<4x256xf32>
    %c0_4 = arith.constant 0 : index
    %c0_5 = arith.constant 0 : index
    %4 = vector.load %arg4[%c0_4, %c0_5] : memref<9x256xf32, #tpu.memory_space<vmem>>, vector<1x256xf32>
    %5 = vector.broadcast %4 : vector<1x256xf32> to vector<4x256xf32>
    %6 = arith.mulf %3, %5 : vector<4x256xf32>
    %c0_6 = arith.constant 0 : index
    %c0_7 = arith.constant 0 : index
    %c0_8 = arith.constant 0 : index
    %7 = vector.load %arg2[%c0_6, %c0_7, %c0_8] : memref<9x8x4xf32, #tpu.memory_space<vmem>>, vector<1x8x4xf32>
    %8 = vector.shape_cast %7 : vector<1x8x4xf32> to vector<8x4xf32>
    %cst = arith.constant dense<0.000000e+00> : vector<8x256xf32>
    %9 = tpu.matmul %8, %6, %cst {dimension_numbers = #tpu.dot_dimension_numbers<[1], [0], [0], [1], [0, 0, 1, 1], [], []>} : vector<8x4xf32>, vector<4x256xf32>, vector<8x256xf32> -> vector<8x256xf32>
    %c16_i32 = arith.constant 16 : i32
    %10 = tpu.dynamic_rotate %2 by %c16_i32 dim 1 : vector<4x256xf32>, i32 -> vector<4x256xf32>
    %c1 = arith.constant 1 : index
    %c0_9 = arith.constant 0 : index
    %11 = vector.load %arg4[%c1, %c0_9] : memref<9x256xf32, #tpu.memory_space<vmem>>, vector<1x256xf32>
    %12 = vector.broadcast %11 : vector<1x256xf32> to vector<4x256xf32>
    %13 = arith.mulf %10, %12 : vector<4x256xf32>
    %c1_10 = arith.constant 1 : index
    %c0_11 = arith.constant 0 : index
    %c0_12 = arith.constant 0 : index
    %14 = vector.load %arg2[%c1_10, %c0_11, %c0_12] : memref<9x8x4xf32, #tpu.memory_space<vmem>>, vector<1x8x4xf32>
    %15 = vector.shape_cast %14 : vector<1x8x4xf32> to vector<8x4xf32>
    %cst_13 = arith.constant dense<0.000000e+00> : vector<8x256xf32>
    %16 = tpu.matmul %15, %13, %cst_13 {dimension_numbers = #tpu.dot_dimension_numbers<[1], [0], [0], [1], [0, 0, 1, 1], [], []>} : vector<8x4xf32>, vector<4x256xf32>, vector<8x256xf32> -> vector<8x256xf32>
    %17 = arith.addf %9, %16 : vector<8x256xf32>
    %c15_i32 = arith.constant 15 : i32
    %18 = tpu.dynamic_rotate %2 by %c15_i32 dim 1 : vector<4x256xf32>, i32 -> vector<4x256xf32>
    %c2 = arith.constant 2 : index
    %c0_14 = arith.constant 0 : index
    %19 = vector.load %arg4[%c2, %c0_14] : memref<9x256xf32, #tpu.memory_space<vmem>>, vector<1x256xf32>
    %20 = vector.broadcast %19 : vector<1x256xf32> to vector<4x256xf32>
    %21 = arith.mulf %18, %20 : vector<4x256xf32>
    %c2_15 = arith.constant 2 : index
    %c0_16 = arith.constant 0 : index
    %c0_17 = arith.constant 0 : index
    %22 = vector.load %arg2[%c2_15, %c0_16, %c0_17] : memref<9x8x4xf32, #tpu.memory_space<vmem>>, vector<1x8x4xf32>
    %23 = vector.shape_cast %22 : vector<1x8x4xf32> to vector<8x4xf32>
    %cst_18 = arith.constant dense<0.000000e+00> : vector<8x256xf32>
    %24 = tpu.matmul %23, %21, %cst_18 {dimension_numbers = #tpu.dot_dimension_numbers<[1], [0], [0], [1], [0, 0, 1, 1], [], []>} : vector<8x4xf32>, vector<4x256xf32>, vector<8x256xf32> -> vector<8x256xf32>
    %25 = arith.addf %17, %24 : vector<8x256xf32>
    %c1_i32 = arith.constant 1 : i32
    %26 = tpu.dynamic_rotate %2 by %c1_i32 dim 1 : vector<4x256xf32>, i32 -> vector<4x256xf32>
    %c3 = arith.constant 3 : index
    %c0_19 = arith.constant 0 : index
    %27 = vector.load %arg4[%c3, %c0_19] : memref<9x256xf32, #tpu.memory_space<vmem>>, vector<1x256xf32>
    %28 = vector.broadcast %27 : vector<1x256xf32> to vector<4x256xf32>
    %29 = arith.mulf %26, %28 : vector<4x256xf32>
    %c3_20 = arith.constant 3 : index
    %c0_21 = arith.constant 0 : index
    %c0_22 = arith.constant 0 : index
    %30 = vector.load %arg2[%c3_20, %c0_21, %c0_22] : memref<9x8x4xf32, #tpu.memory_space<vmem>>, vector<1x8x4xf32>
    %31 = vector.shape_cast %30 : vector<1x8x4xf32> to vector<8x4xf32>
    %cst_23 = arith.constant dense<0.000000e+00> : vector<8x256xf32>
    %32 = tpu.matmul %31, %29, %cst_23 {dimension_numbers = #tpu.dot_dimension_numbers<[1], [0], [0], [1], [0, 0, 1, 1], [], []>} : vector<8x4xf32>, vector<4x256xf32>, vector<8x256xf32> -> vector<8x256xf32>
    %33 = arith.addf %25, %32 : vector<8x256xf32>
    %c4 = arith.constant 4 : index
    %c0_24 = arith.constant 0 : index
    %34 = vector.load %arg4[%c4, %c0_24] : memref<9x256xf32, #tpu.memory_space<vmem>>, vector<1x256xf32>
    %35 = vector.broadcast %34 : vector<1x256xf32> to vector<4x256xf32>
    %36 = arith.mulf %2, %35 : vector<4x256xf32>
    %c4_25 = arith.constant 4 : index
    %c0_26 = arith.constant 0 : index
    %c0_27 = arith.constant 0 : index
    %37 = vector.load %arg2[%c4_25, %c0_26, %c0_27] : memref<9x8x4xf32, #tpu.memory_space<vmem>>, vector<1x8x4xf32>
    %38 = vector.shape_cast %37 : vector<1x8x4xf32> to vector<8x4xf32>
    %cst_28 = arith.constant dense<0.000000e+00> : vector<8x256xf32>
    %39 = tpu.matmul %38, %36, %cst_28 {dimension_numbers = #tpu.dot_dimension_numbers<[1], [0], [0], [1], [0, 0, 1, 1], [], []>} : vector<8x4xf32>, vector<4x256xf32>, vector<8x256xf32> -> vector<8x256xf32>
    %40 = arith.addf %33, %39 : vector<8x256xf32>
    %c255_i32 = arith.constant 255 : i32
    %41 = tpu.dynamic_rotate %2 by %c255_i32 dim 1 : vector<4x256xf32>, i32 -> vector<4x256xf32>
    %c5 = arith.constant 5 : index
    %c0_29 = arith.constant 0 : index
    %42 = vector.load %arg4[%c5, %c0_29] : memref<9x256xf32, #tpu.memory_space<vmem>>, vector<1x256xf32>
    %43 = vector.broadcast %42 : vector<1x256xf32> to vector<4x256xf32>
    %44 = arith.mulf %41, %43 : vector<4x256xf32>
    %c5_30 = arith.constant 5 : index
    %c0_31 = arith.constant 0 : index
    %c0_32 = arith.constant 0 : index
    %45 = vector.load %arg2[%c5_30, %c0_31, %c0_32] : memref<9x8x4xf32, #tpu.memory_space<vmem>>, vector<1x8x4xf32>
    %46 = vector.shape_cast %45 : vector<1x8x4xf32> to vector<8x4xf32>
    %cst_33 = arith.constant dense<0.000000e+00> : vector<8x256xf32>
    %47 = tpu.matmul %46, %44, %cst_33 {dimension_numbers = #tpu.dot_dimension_numbers<[1], [0], [0], [1], [0, 0, 1, 1], [], []>} : vector<8x4xf32>, vector<4x256xf32>, vector<8x256xf32> -> vector<8x256xf32>
    %48 = arith.addf %40, %47 : vector<8x256xf32>
    %c241_i32 = arith.constant 241 : i32
    %49 = tpu.dynamic_rotate %2 by %c241_i32 dim 1 : vector<4x256xf32>, i32 -> vector<4x256xf32>
    %c6 = arith.constant 6 : index
    %c0_34 = arith.constant 0 : index
    %50 = vector.load %arg4[%c6, %c0_34] : memref<9x256xf32, #tpu.memory_space<vmem>>, vector<1x256xf32>
    %51 = vector.broadcast %50 : vector<1x256xf32> to vector<4x256xf32>
    %52 = arith.mulf %49, %51 : vector<4x256xf32>
    %c6_35 = arith.constant 6 : index
    %c0_36 = arith.constant 0 : index
    %c0_37 = arith.constant 0 : index
    %53 = vector.load %arg2[%c6_35, %c0_36, %c0_37] : memref<9x8x4xf32, #tpu.memory_space<vmem>>, vector<1x8x4xf32>
    %54 = vector.shape_cast %53 : vector<1x8x4xf32> to vector<8x4xf32>
    %cst_38 = arith.constant dense<0.000000e+00> : vector<8x256xf32>
    %55 = tpu.matmul %54, %52, %cst_38 {dimension_numbers = #tpu.dot_dimension_numbers<[1], [0], [0], [1], [0, 0, 1, 1], [], []>} : vector<8x4xf32>, vector<4x256xf32>, vector<8x256xf32> -> vector<8x256xf32>
    %56 = arith.addf %48, %55 : vector<8x256xf32>
    %c240_i32 = arith.constant 240 : i32
    %57 = tpu.dynamic_rotate %2 by %c240_i32 dim 1 : vector<4x256xf32>, i32 -> vector<4x256xf32>
    %c7 = arith.constant 7 : index
    %c0_39 = arith.constant 0 : index
    %58 = vector.load %arg4[%c7, %c0_39] : memref<9x256xf32, #tpu.memory_space<vmem>>, vector<1x256xf32>
    %59 = vector.broadcast %58 : vector<1x256xf32> to vector<4x256xf32>
    %60 = arith.mulf %57, %59 : vector<4x256xf32>
    %c7_40 = arith.constant 7 : index
    %c0_41 = arith.constant 0 : index
    %c0_42 = arith.constant 0 : index
    %61 = vector.load %arg2[%c7_40, %c0_41, %c0_42] : memref<9x8x4xf32, #tpu.memory_space<vmem>>, vector<1x8x4xf32>
    %62 = vector.shape_cast %61 : vector<1x8x4xf32> to vector<8x4xf32>
    %cst_43 = arith.constant dense<0.000000e+00> : vector<8x256xf32>
    %63 = tpu.matmul %62, %60, %cst_43 {dimension_numbers = #tpu.dot_dimension_numbers<[1], [0], [0], [1], [0, 0, 1, 1], [], []>} : vector<8x4xf32>, vector<4x256xf32>, vector<8x256xf32> -> vector<8x256xf32>
    %64 = arith.addf %56, %63 : vector<8x256xf32>
    %c239_i32 = arith.constant 239 : i32
    %65 = tpu.dynamic_rotate %2 by %c239_i32 dim 1 : vector<4x256xf32>, i32 -> vector<4x256xf32>
    %c8 = arith.constant 8 : index
    %c0_44 = arith.constant 0 : index
    %66 = vector.load %arg4[%c8, %c0_44] : memref<9x256xf32, #tpu.memory_space<vmem>>, vector<1x256xf32>
    %67 = vector.broadcast %66 : vector<1x256xf32> to vector<4x256xf32>
    %68 = arith.mulf %65, %67 : vector<4x256xf32>
    %c8_45 = arith.constant 8 : index
    %c0_46 = arith.constant 0 : index
    %c0_47 = arith.constant 0 : index
    %69 = vector.load %arg2[%c8_45, %c0_46, %c0_47] : memref<9x8x4xf32, #tpu.memory_space<vmem>>, vector<1x8x4xf32>
    %70 = vector.shape_cast %69 : vector<1x8x4xf32> to vector<8x4xf32>
    %cst_48 = arith.constant dense<0.000000e+00> : vector<8x256xf32>
    %71 = tpu.matmul %70, %68, %cst_48 {dimension_numbers = #tpu.dot_dimension_numbers<[1], [0], [0], [1], [0, 0, 1, 1], [], []>} : vector<8x4xf32>, vector<4x256xf32>, vector<8x256xf32> -> vector<8x256xf32>
    %72 = arith.addf %64, %71 : vector<8x256xf32>
    %73 = vector.broadcast %0 : vector<8x1xf32> to vector<8x256xf32>
    %74 = arith.addf %72, %73 : vector<8x256xf32>
    %cst_49 = arith.constant 0.000000e+00 : f32
    %75 = vector.broadcast %cst_49 : f32 to vector<8x256xf32>
    %76 = arith.maximumf %74, %75 : vector<8x256xf32>
    %c0_50 = arith.constant 0 : index
    %c0_51 = arith.constant 0 : index
    %c0_52 = arith.constant 0 : index
    %77 = vector.load %arg5[%c0_50, %c0_51, %c0_52] : memref<2x8x256xf32, #tpu.memory_space<vmem>>, vector<1x8x256xf32>
    %78 = vector.shape_cast %77 : vector<1x8x256xf32> to vector<8x256xf32>
    %79 = vector.shape_cast %76 : vector<8x256xf32> to vector<1x8x256xf32>
    tpu.vector_store %arg5[%c0_50, %c0_51, %c0_52], %79 {strides = array<i32>} : memref<2x8x256xf32, #tpu.memory_space<vmem>>, vector<1x8x256xf32>,
    %c1_53 = arith.constant 1 : index
    %c0_54 = arith.constant 0 : index
    %c0_55 = arith.constant 0 : index
    %80 = vector.load %arg1[%c1_53, %c0_54, %c0_55] : memref<2x4x256xf32, #tpu.memory_space<vmem>>, vector<1x4x256xf32>
    %81 = vector.shape_cast %80 : vector<1x4x256xf32> to vector<4x256xf32>
    %c17_i32_56 = arith.constant 17 : i32
    %82 = tpu.dynamic_rotate %81 by %c17_i32_56 dim 1 : vector<4x256xf32>, i32 -> vector<4x256xf32>
    %c0_57 = arith.constant 0 : index
    %c0_58 = arith.constant 0 : index
    %83 = vector.load %arg4[%c0_57, %c0_58] : memref<9x256xf32, #tpu.memory_space<vmem>>, vector<1x256xf32>
    %84 = vector.broadcast %83 : vector<1x256xf32> to vector<4x256xf32>
    %85 = arith.mulf %82, %84 : vector<4x256xf32>
    %c0_59 = arith.constant 0 : index
    %c0_60 = arith.constant 0 : index
    %c0_61 = arith.constant 0 : index
    %86 = vector.load %arg2[%c0_59, %c0_60, %c0_61] : memref<9x8x4xf32, #tpu.memory_space<vmem>>, vector<1x8x4xf32>
    %87 = vector.shape_cast %86 : vector<1x8x4xf32> to vector<8x4xf32>
    %cst_62 = arith.constant dense<0.000000e+00> : vector<8x256xf32>
    %88 = tpu.matmul %87, %85, %cst_62 {dimension_numbers = #tpu.dot_dimension_numbers<[1], [0], [0], [1], [0, 0, 1, 1], [], []>} : vector<8x4xf32>, vector<4x256xf32>, vector<8x256xf32> -> vector<8x256xf32>
    %c16_i32_63 = arith.constant 16 : i32
    %89 = tpu.dynamic_rotate %81 by %c16_i32_63 dim 1 : vector<4x256xf32>, i32 -> vector<4x256xf32>
    %c1_64 = arith.constant 1 : index
    %c0_65 = arith.constant 0 : index
    %90 = vector.load %arg4[%c1_64, %c0_65] : memref<9x256xf32, #tpu.memory_space<vmem>>, vector<1x256xf32>
    %91 = vector.broadcast %90 : vector<1x256xf32> to vector<4x256xf32>
    %92 = arith.mulf %89, %91 : vector<4x256xf32>
    %c1_66 = arith.constant 1 : index
    %c0_67 = arith.constant 0 : index
    %c0_68 = arith.constant 0 : index
    %93 = vector.load %arg2[%c1_66, %c0_67, %c0_68] : memref<9x8x4xf32, #tpu.memory_space<vmem>>, vector<1x8x4xf32>
    %94 = vector.shape_cast %93 : vector<1x8x4xf32> to vector<8x4xf32>
    %cst_69 = arith.constant dense<0.000000e+00> : vector<8x256xf32>
    %95 = tpu.matmul %94, %92, %cst_69 {dimension_numbers = #tpu.dot_dimension_numbers<[1], [0], [0], [1], [0, 0, 1, 1], [], []>} : vector<8x4xf32>, vector<4x256xf32>, vector<8x256xf32> -> vector<8x256xf32>
    %96 = arith.addf %88, %95 : vector<8x256xf32>
    %c15_i32_70 = arith.constant 15 : i32
    %97 = tpu.dynamic_rotate %81 by %c15_i32_70 dim 1 : vector<4x256xf32>, i32 -> vector<4x256xf32>
    %c2_71 = arith.constant 2 : index
    %c0_72 = arith.constant 0 : index
    %98 = vector.load %arg4[%c2_71, %c0_72] : memref<9x256xf32, #tpu.memory_space<vmem>>, vector<1x256xf32>
    %99 = vector.broadcast %98 : vector<1x256xf32> to vector<4x256xf32>
    %100 = arith.mulf %97, %99 : vector<4x256xf32>
    %c2_73 = arith.constant 2 : index
    %c0_74 = arith.constant 0 : index
    %c0_75 = arith.constant 0 : index
    %101 = vector.load %arg2[%c2_73, %c0_74, %c0_75] : memref<9x8x4xf32, #tpu.memory_space<vmem>>, vector<1x8x4xf32>
    %102 = vector.shape_cast %101 : vector<1x8x4xf32> to vector<8x4xf32>
    %cst_76 = arith.constant dense<0.000000e+00> : vector<8x256xf32>
    %103 = tpu.matmul %102, %100, %cst_76 {dimension_numbers = #tpu.dot_dimension_numbers<[1], [0], [0], [1], [0, 0, 1, 1], [], []>} : vector<8x4xf32>, vector<4x256xf32>, vector<8x256xf32> -> vector<8x256xf32>
    %104 = arith.addf %96, %103 : vector<8x256xf32>
    %c1_i32_77 = arith.constant 1 : i32
    %105 = tpu.dynamic_rotate %81 by %c1_i32_77 dim 1 : vector<4x256xf32>, i32 -> vector<4x256xf32>
    %c3_78 = arith.constant 3 : index
    %c0_79 = arith.constant 0 : index
    %106 = vector.load %arg4[%c3_78, %c0_79] : memref<9x256xf32, #tpu.memory_space<vmem>>, vector<1x256xf32>
    %107 = vector.broadcast %106 : vector<1x256xf32> to vector<4x256xf32>
    %108 = arith.mulf %105, %107 : vector<4x256xf32>
    %c3_80 = arith.constant 3 : index
    %c0_81 = arith.constant 0 : index
    %c0_82 = arith.constant 0 : index
    %109 = vector.load %arg2[%c3_80, %c0_81, %c0_82] : memref<9x8x4xf32, #tpu.memory_space<vmem>>, vector<1x8x4xf32>
    %110 = vector.shape_cast %109 : vector<1x8x4xf32> to vector<8x4xf32>
    %cst_83 = arith.constant dense<0.000000e+00> : vector<8x256xf32>
    %111 = tpu.matmul %110, %108, %cst_83 {dimension_numbers = #tpu.dot_dimension_numbers<[1], [0], [0], [1], [0, 0, 1, 1], [], []>} : vector<8x4xf32>, vector<4x256xf32>, vector<8x256xf32> -> vector<8x256xf32>
    %112 = arith.addf %104, %111 : vector<8x256xf32>
    %c4_84 = arith.constant 4 : index
    %c0_85 = arith.constant 0 : index
    %113 = vector.load %arg4[%c4_84, %c0_85] : memref<9x256xf32, #tpu.memory_space<vmem>>, vector<1x256xf32>
    %114 = vector.broadcast %113 : vector<1x256xf32> to vector<4x256xf32>
    %115 = arith.mulf %81, %114 : vector<4x256xf32>
    %c4_86 = arith.constant 4 : index
    %c0_87 = arith.constant 0 : index
    %c0_88 = arith.constant 0 : index
    %116 = vector.load %arg2[%c4_86, %c0_87, %c0_88] : memref<9x8x4xf32, #tpu.memory_space<vmem>>, vector<1x8x4xf32>
    %117 = vector.shape_cast %116 : vector<1x8x4xf32> to vector<8x4xf32>
    %cst_89 = arith.constant dense<0.000000e+00> : vector<8x256xf32>
    %118 = tpu.matmul %117, %115, %cst_89 {dimension_numbers = #tpu.dot_dimension_numbers<[1], [0], [0], [1], [0, 0, 1, 1], [], []>} : vector<8x4xf32>, vector<4x256xf32>, vector<8x256xf32> -> vector<8x256xf32>
    %119 = arith.addf %112, %118 : vector<8x256xf32>
    %c255_i32_90 = arith.constant 255 : i32
    %120 = tpu.dynamic_rotate %81 by %c255_i32_90 dim 1 : vector<4x256xf32>, i32 -> vector<4x256xf32>
    %c5_91 = arith.constant 5 : index
    %c0_92 = arith.constant 0 : index
    %121 = vector.load %arg4[%c5_91, %c0_92] : memref<9x256xf32, #tpu.memory_space<vmem>>, vector<1x256xf32>
    %122 = vector.broadcast %121 : vector<1x256xf32> to vector<4x256xf32>
    %123 = arith.mulf %120, %122 : vector<4x256xf32>
    %c5_93 = arith.constant 5 : index
    %c0_94 = arith.constant 0 : index
    %c0_95 = arith.constant 0 : index
    %124 = vector.load %arg2[%c5_93, %c0_94, %c0_95] : memref<9x8x4xf32, #tpu.memory_space<vmem>>, vector<1x8x4xf32>
    %125 = vector.shape_cast %124 : vector<1x8x4xf32> to vector<8x4xf32>
    %cst_96 = arith.constant dense<0.000000e+00> : vector<8x256xf32>
    %126 = tpu.matmul %125, %123, %cst_96 {dimension_numbers = #tpu.dot_dimension_numbers<[1], [0], [0], [1], [0, 0, 1, 1], [], []>} : vector<8x4xf32>, vector<4x256xf32>, vector<8x256xf32> -> vector<8x256xf32>
    %127 = arith.addf %119, %126 : vector<8x256xf32>
    %c241_i32_97 = arith.constant 241 : i32
    %128 = tpu.dynamic_rotate %81 by %c241_i32_97 dim 1 : vector<4x256xf32>, i32 -> vector<4x256xf32>
    %c6_98 = arith.constant 6 : index
    %c0_99 = arith.constant 0 : index
    %129 = vector.load %arg4[%c6_98, %c0_99] : memref<9x256xf32, #tpu.memory_space<vmem>>, vector<1x256xf32>
    %130 = vector.broadcast %129 : vector<1x256xf32> to vector<4x256xf32>
    %131 = arith.mulf %128, %130 : vector<4x256xf32>
    %c6_100 = arith.constant 6 : index
    %c0_101 = arith.constant 0 : index
    %c0_102 = arith.constant 0 : index
    %132 = vector.load %arg2[%c6_100, %c0_101, %c0_102] : memref<9x8x4xf32, #tpu.memory_space<vmem>>, vector<1x8x4xf32>
    %133 = vector.shape_cast %132 : vector<1x8x4xf32> to vector<8x4xf32>
    %cst_103 = arith.constant dense<0.000000e+00> : vector<8x256xf32>
    %134 = tpu.matmul %133, %131, %cst_103 {dimension_numbers = #tpu.dot_dimension_numbers<[1], [0], [0], [1], [0, 0, 1, 1], [], []>} : vector<8x4xf32>, vector<4x256xf32>, vector<8x256xf32> -> vector<8x256xf32>
    %135 = arith.addf %127, %134 : vector<8x256xf32>
    %c240_i32_104 = arith.constant 240 : i32
    %136 = tpu.dynamic_rotate %81 by %c240_i32_104 dim 1 : vector<4x256xf32>, i32 -> vector<4x256xf32>
    %c7_105 = arith.constant 7 : index
    %c0_106 = arith.constant 0 : index
    %137 = vector.load %arg4[%c7_105, %c0_106] : memref<9x256xf32, #tpu.memory_space<vmem>>, vector<1x256xf32>
    %138 = vector.broadcast %137 : vector<1x256xf32> to vector<4x256xf32>
    %139 = arith.mulf %136, %138 : vector<4x256xf32>
    %c7_107 = arith.constant 7 : index
    %c0_108 = arith.constant 0 : index
    %c0_109 = arith.constant 0 : index
    %140 = vector.load %arg2[%c7_107, %c0_108, %c0_109] : memref<9x8x4xf32, #tpu.memory_space<vmem>>, vector<1x8x4xf32>
    %141 = vector.shape_cast %140 : vector<1x8x4xf32> to vector<8x4xf32>
    %cst_110 = arith.constant dense<0.000000e+00> : vector<8x256xf32>
    %142 = tpu.matmul %141, %139, %cst_110 {dimension_numbers = #tpu.dot_dimension_numbers<[1], [0], [0], [1], [0, 0, 1, 1], [], []>} : vector<8x4xf32>, vector<4x256xf32>, vector<8x256xf32> -> vector<8x256xf32>
    %143 = arith.addf %135, %142 : vector<8x256xf32>
    %c239_i32_111 = arith.constant 239 : i32
    %144 = tpu.dynamic_rotate %81 by %c239_i32_111 dim 1 : vector<4x256xf32>, i32 -> vector<4x256xf32>
    %c8_112 = arith.constant 8 : index
    %c0_113 = arith.constant 0 : index
    %145 = vector.load %arg4[%c8_112, %c0_113] : memref<9x256xf32, #tpu.memory_space<vmem>>, vector<1x256xf32>
    %146 = vector.broadcast %145 : vector<1x256xf32> to vector<4x256xf32>
    %147 = arith.mulf %144, %146 : vector<4x256xf32>
    %c8_114 = arith.constant 8 : index
    %c0_115 = arith.constant 0 : index
    %c0_116 = arith.constant 0 : index
    %148 = vector.load %arg2[%c8_114, %c0_115, %c0_116] : memref<9x8x4xf32, #tpu.memory_space<vmem>>, vector<1x8x4xf32>
    %149 = vector.shape_cast %148 : vector<1x8x4xf32> to vector<8x4xf32>
    %cst_117 = arith.constant dense<0.000000e+00> : vector<8x256xf32>
    %150 = tpu.matmul %149, %147, %cst_117 {dimension_numbers = #tpu.dot_dimension_numbers<[1], [0], [0], [1], [0, 0, 1, 1], [], []>} : vector<8x4xf32>, vector<4x256xf32>, vector<8x256xf32> -> vector<8x256xf32>
    %151 = arith.addf %143, %150 : vector<8x256xf32>
    %152 = vector.broadcast %0 : vector<8x1xf32> to vector<8x256xf32>
    %153 = arith.addf %151, %152 : vector<8x256xf32>
    %cst_118 = arith.constant 0.000000e+00 : f32
    %154 = vector.broadcast %cst_118 : f32 to vector<8x256xf32>
    %155 = arith.maximumf %153, %154 : vector<8x256xf32>
    %c1_119 = arith.constant 1 : index
    %c0_120 = arith.constant 0 : index
    %c0_121 = arith.constant 0 : index
    %156 = vector.load %arg5[%c1_119, %c0_120, %c0_121] : memref<2x8x256xf32, #tpu.memory_space<vmem>>, vector<1x8x256xf32>
    %157 = vector.shape_cast %156 : vector<1x8x256xf32> to vector<8x256xf32>
    %158 = vector.shape_cast %155 : vector<8x256xf32> to vector<1x8x256xf32>
    tpu.vector_store %arg5[%c1_119, %c0_120, %c0_121], %158 {strides = array<i32>} : memref<2x8x256xf32, #tpu.memory_space<vmem>>, vector<1x8x256xf32>,
    return
  }
  func.func @transform_0(%arg0: i32) -> (i32, i32, i32) {
    %c0_i32 = arith.constant 0 : i32
    %c0_i32_0 = arith.constant 0 : i32
    %c0_i32_1 = arith.constant 0 : i32
    return %arg0, %c0_i32, %c0_i32_0 : i32, i32, i32
  }
  func.func @transform_1(%arg0: i32) -> (i32, i32, i32) {
    %c0_i32 = arith.constant 0 : i32
    %c0_i32_0 = arith.constant 0 : i32
    %c0_i32_1 = arith.constant 0 : i32
    %c0_i32_2 = arith.constant 0 : i32
    return %c0_i32, %c0_i32_0, %c0_i32_1 : i32, i32, i32
  }
  func.func @transform_2(%arg0: i32) -> (i32, i32) {
    %c0_i32 = arith.constant 0 : i32
    %c0_i32_0 = arith.constant 0 : i32
    %c0_i32_1 = arith.constant 0 : i32
    return %c0_i32, %c0_i32_0 : i32, i32
  }
  func.func @transform_3(%arg0: i32) -> (i32, i32) {
    %c0_i32 = arith.constant 0 : i32
    %c0_i32_0 = arith.constant 0 : i32
    %c0_i32_1 = arith.constant 0 : i32
    return %c0_i32, %c0_i32_0 : i32, i32
  }
  func.func @transform_4(%arg0: i32) -> (i32, i32, i32) {
    %c0_i32 = arith.constant 0 : i32
    %c0_i32_0 = arith.constant 0 : i32
    %c0_i32_1 = arith.constant 0 : i32
    return %arg0, %c0_i32, %c0_i32_0 : i32, i32, i32
  }
}

</mosaic_0001>

<bundles_post_ra>
// kernel: tpu_custom_call.1
= control target key start
LH: loop header
LB: loop body
LE: loop exit
PB: predicated region body
PF: predicated region fallthrough
CT: control target
= control target key end

     0   :  { %s2046_s17 = smov 17   ;;  %s2047_s18 = smov 16   ;;  %v2048_v2 = vmov 0.0   ;;  %s2433_s0 = inlined_call_operand.vmem [shape: f32[2,4,256], index: 0, kind: input, shape index: {}]   ;;  %s2434_s1 = inlined_call_operand.vmem [shape: f32[9,8,4], index: 1, kind: input, shape index: {}]   ;;  %s2435_s2 = inlined_call_operand.vmem [shape: f32[8,1], index: 2, kind: input, shape index: {}]   ;;  %s2436_s3 = inlined_call_operand.vmem [shape: f32[9,256], index: 3, kind: input, shape index: {}]   ;;  %s2437_s4 = inlined_call_operand.hbm [shape: f32[2,8,256], index: 4, kind: output, shape index: {}]  }
   0x1   :  { %v2086_v0 = vld [vmem:[%s2433_s0] sm:$0xff]  ;;  %146 = vmatprep.mubr.f32.mxu0 %v2048_v2  ;;  %226 = vmatprep.mubr.f32.mxu1 %v2048_v2 }
   0x2   :  { %23 = vrot.lane.b32.xlu1 %v2086_v0, %s2046_s17  ;;  %47 = vrot.lane.b32.xlu0 %v2086_v0, %s2047_s18  ;;  %v21_v1 = vcombine.high %v2086_v0, %v2086_v0 }
   0x3   :  { %9 = vsyncpa [#allocation3], 0  ;;  %s2049_s19 = smov 15   ;;  %s2050_s20 = smov 1   ;;  %v2106_v3 = vld [vmem:[%s2433_s0 + $0x8] sm:$0xff]  ;;  %v2055_v5 = vmov 0   ;;  %v27_v7 = vlaneseq }
   0x4   :  { %s2051_s21 = smov 127   ;;  %s2052_s22 = smov 113   ;;  %v981_v4 = vcombine.high %v2106_v3, %v2106_v3  ;;  %2021 = vset.pattern.permute.xlu0 %v2055_v5  ;;  %v18_v6 = vld [vmem:[%s2435_s2] sm:$0xff]  ;;  %vm75_vm2 = vcmask 1043456   ;;  %v2170_v39 = vld [vmem:[%s2434_s1 + $0x8] sm:$0xff]  ;;  %vm71_vm4 = vcmask 31744  }
   0x5   :  { %s2053_s23 = smov 112   ;;  %s2054_s26 = smov 111   ;;  %v35_v8 = vshrl.u32 %v27_v7, 7  ;;  %v1940_v9 = vld [vmem:[%s2436_s3 + $0x4] ss:$8 sm:$0x3] }
   0x6   :  { %25 = vrot.lane.b32.xlu1 %v21_v1, %s2046_s17  ;;  %49 = vrot.lane.b32.xlu0 %v21_v1, %s2047_s18  ;;  %v2135_v14 = vand.u32 127, %v27_v7  ;;  %v32_v15 = vld [vmem:[%s2436_s3] ss:$8 sm:$0x3]  ;;  %v2200_v51 = vld [vmem:[%s2434_s1 + $0x10] sm:$0xff] }
   0x7   :  { %v2129_v10 = vsub.s32 0, %v35_v8  ;;  %v2131_v11 = vsub.s32 1, %v35_v8  ;;  %v1922_v16 = vld [vmem:[%s2436_s3 + $0x1] ss:$8 sm:$0x3]  ;;  %v2220_v61 = vld [vmem:[%s2434_s1 + $0x18] sm:$0xff] }
   0x8   :  { %vm29_vm0 = vcmp.lt.s32.totalorder %v2135_v14, 17  ;;  %vm51_vm1 = vcmp.lt.s32.totalorder %v2135_v14, 16  ;;  %v1930_v20 = vld [vmem:[%s2436_s3 + $0x2] ss:$8 sm:$0x3]  ;;  %vm237_vm3 = vcmp.lt.s32.totalorder %v2135_v14, 15 }
   0x9   :  { %v451_v12 = vrot.slane %v1940_v9, %v2129_v10  ;;  %v455_v13 = vrot.slane %v1940_v9, %v2131_v11  ;;  %v37_v21 = vrot.slane %v32_v15, %v2129_v10  ;;  %v60_v22 = vrot.slane %v1922_v16, %v2129_v10  ;;  %v1935_v34 = vld [vmem:[%s2436_s3 + $0x3] ss:$8 sm:$0x3]  ;;  %v1945_v49 = vld [vmem:[%s2436_s3 + $0x5] ss:$8 sm:$0x3] }
   0xa   :  { %235 = vrot.lane.b32.xlu1 %v21_v1, %s2049_s19  ;;  %233 = vrot.lane.b32.xlu0 %v2086_v0, %s2049_s19  ;;  %v41_v23 = vrot.slane %v32_v15, %v2131_v11  ;;  %v64_v24 = vrot.slane %v1922_v16, %v2131_v11  ;;  %v246_v27 = vrot.slane %v1930_v20, %v2129_v10  ;;  %v2175_v40 = vld [vmem:[%s2434_s1] sm:$0xff]  ;;  %vm343_vm5 = vcmp.lt.s32.totalorder %v2135_v14, 1 }
   0xb   :  { %v456_v19 = vcombine.low %v451_v12, %v455_v13  ;;  %v250_v28 = vrot.slane %v1930_v20, %v2131_v11  ;;  %v352_v43 = vrot.slane %v1935_v34, %v2129_v10  ;;  %v356_v46 = vrot.slane %v1935_v34, %v2131_v11  ;;  %v1950_v60 = vld [vmem:[%s2436_s3 + $0x6] ss:$8 sm:$0x3]  ;;  %v1955_v9 = vld [vmem:[%s2436_s3 + $0x7] ss:$8 sm:$0x3] }
   0xc   :  { %v556_v56 = vrot.slane %v1945_v49, %v2129_v10  ;;  %vm547_vm6 = vcmp.lt.s32.totalorder %v2135_v14, 127  ;;  %v560_v59 = vrot.slane %v1945_v49, %v2131_v11  ;;  %v2227_v62 = vld [vmem:[%s2434_s1 + $0x20] sm:$0xff]  ;;  %v662_v5 = vrot.slane %v1950_v60, %v2129_v10  ;;  %v2249_v12 = vld [vmem:[%s2434_s1 + $0x28] sm:$0xff] }
   0xd   :  { %v458_v29 = vmul.f32 %v456_v19, %v2086_v0  ;;  %vm653_vm7 = vcmp.lt.s32.totalorder %v2135_v14, 113  ;;  %v666_v8 = vrot.slane %v1950_v60, %v2131_v11  ;;  %vm759_vm8 = vcmp.lt.s32.totalorder %v2135_v14, 112  ;;  %v1984_v34 = vld [vmem:[%s2436_s3 + $0x4] ss:$8 sm:$0x3] }
   0xe   :  { %341 = vrot.lane.b32.xlu1 %v21_v1, %s2050_s20  ;;  %339 = vrot.lane.b32.xlu0 %v2086_v0, %s2050_s20  ;;  %v768_v20 = vrot.slane %v1955_v9, %v2129_v10  ;;  %vm865_vm9 = vcmp.lt.s32.totalorder %v2135_v14, 111 }
   0xf   :  { %v462_v50 = vcombine.high %v458_v29, %v458_v29 }
  0x12   :  { %545 = vrot.lane.b32.xlu1 %v21_v1, %s2051_s21  ;;  %543 = vrot.lane.b32.xlu0 %v2086_v0, %s2051_s21 }
  0x16   :  { %651 = vrot.lane.b32.xlu1 %v21_v1, %s2052_s22  ;;  %649 = vrot.lane.b32.xlu0 %v2086_v0, %s2052_s22 }
  0x1a   :  { %757 = vrot.lane.b32.xlu1 %v21_v1, %s2053_s23  ;;  %755 = vrot.lane.b32.xlu0 %v2086_v0, %s2053_s23 }
  0x1e   :  { %863 = vrot.lane.b32.xlu1 %v21_v1, %s2054_s26  ;;  %861 = vrot.lane.b32.xlu0 %v2086_v0, %s2054_s26 }
  0x22   :  { %1006 = vrot.lane.b32.xlu1 %v981_v4, %s2047_s18  ;;  %1004 = vrot.lane.b32.xlu0 %v2106_v3, %s2047_s18 }
  0x26   :  { %985 = vrot.lane.b32.xlu1 %v981_v4, %s2046_s17  ;;  %983 = vrot.lane.b32.xlu0 %v2106_v3, %s2046_s17 }
  0x2a   :  { %1187 = vrot.lane.b32.xlu1 %v981_v4, %s2049_s19  ;;  %1185 = vrot.lane.b32.xlu0 %v2106_v3, %s2049_s19 }
  0x2e   :  { %1290 = vrot.lane.b32.xlu1 %v981_v4, %s2050_s20  ;;  %1288 = vrot.lane.b32.xlu0 %v2106_v3, %s2050_s20 }
  0x32   :  { %1489 = vrot.lane.b32.xlu1 %v981_v4, %s2051_s21  ;;  %1487 = vrot.lane.b32.xlu0 %v2106_v3, %s2051_s21 }
  0x36   :  { %1592 = vrot.lane.b32.xlu1 %v981_v4, %s2052_s22  ;;  %1590 = vrot.lane.b32.xlu0 %v2106_v3, %s2052_s22 }
  0x3a   :  { %1695 = vrot.lane.b32.xlu1 %v981_v4, %s2053_s23  ;;  %1693 = vrot.lane.b32.xlu0 %v2106_v3, %s2053_s23 }
  0x3e   :  { %1798 = vrot.lane.b32.xlu1 %v981_v4, %s2054_s26  ;;  %1796 = vrot.lane.b32.xlu0 %v2106_v3, %s2054_s26 }
  0x42   :  { %969 = vperm.xlu0 %2021, %v18_v6  }
  0x74   :  { %v24_v17 = vpop.permute.xlu1 %23  ;;  %v48_v18 = vpop.permute.xlu0 %47 }
  0x78   :  { %v26_v25 = vpop.permute.xlu1 %25  ;;  %v50_v26 = vpop.permute.xlu0 %49 }
  0x79   :  { %v30_v30 = vsel %vm29_vm0, %v24_v17, %v26_v25  ;;  %v31_v31 = vsel %vm29_vm0, %v26_v25, %v24_v17  ;;  %v52_v32 = vsel %vm51_vm1, %v48_v18, %v50_v26  ;;  %v53_v33 = vsel %vm51_vm1, %v50_v26, %v48_v18 }
  0x7a   :  { %v44_v35 = vmul.f32 %v37_v21, %v31_v31  ;;  %v67_v36 = vmul.f32 %v60_v22, %v53_v33  ;;  %v45_v37 = vmul.f32 %v41_v23, %v30_v30  ;;  %v68_v38 = vmul.f32 %v64_v24, %v52_v32  ;;  %v1960_v22 = vld [vmem:[%s2436_s3 + $0x10] ss:$8 sm:$0x3]  ;;  %v1966_v32 = vld [vmem:[%s2436_s3 + $0x1] ss:$8 sm:$0x3] }
  0x7b   :  { %v772_v21 = vrot.slane %v1955_v9, %v2131_v11  ;;  %v2269_v23 = vld [vmem:[%s2434_s1 + $0x30] sm:$0xff]  ;;  %v874_v30 = vrot.slane %v1960_v22, %v2129_v10  ;;  %v878_v31 = vrot.slane %v1960_v22, %v2131_v11  ;;  %v2289_v33 = vld [vmem:[%s2434_s1 + $0x38] sm:$0xff] }
  0x7c   :  { %1927 = vmatprep.subr.msk.mxu1 %vm75_vm2, %v45_v37  ;;  %v236_v41 = vpop.permute.xlu1 %235  ;;  %1924 = vmatprep.subr.msk.mxu0 %vm75_vm2, %v68_v38  ;;  %v234_v42 = vpop.permute.xlu0 %233 }
  0x7d   :  { %v238_v44 = vsel %vm237_vm3, %v234_v42, %v236_v41  ;;  %v239_v45 = vsel %vm237_vm3, %v236_v41, %v234_v42  ;;  %1925 = vmatpush1.msk.msra.mxu0 %vm75_vm2, %v67_v36  ;;  %1928 = vmatpush1.msk.msra.mxu1 %vm75_vm2, %v44_v35  ;;  %v1015_v41 = vrot.slane %v1966_v32, %v2129_v10 }
  0x7e   :  { %v253_v47 = vmul.f32 %v246_v27, %v239_v45  ;;  %v254_v48 = vmul.f32 %v250_v28, %v238_v44  ;;  %1926 = vmatmul.mubr.msk.f32.vlgmr.msra.gmra.mxu0 %vm71_vm4, %v2170_v39  ;;  %1929 = vmatmul.mubr.msk.f32.vlgmr.msra.gmra.mxu1 %vm71_vm4, %v2175_v40  ;;  %v1019_v42 = vrot.slane %v1966_v32, %v2131_v11  ;;  %v989_v45 = vld [vmem:[%s2436_s3] ss:$8 sm:$0x3] }
  0x7f   :  { %436 = vmatprep.mubr.f32.mxu1 %v2048_v2  ;;  %330 = vmatprep.mubr.f32.mxu0 %v2048_v2 }
  0x80   :  { %v342_v52 = vpop.permute.xlu1 %341  ;;  %1932 = vmatprep.subr.msk.mxu0 %vm75_vm2, %v254_v48  ;;  %v340_v53 = vpop.permute.xlu0 %339  ;;  %v2313_v48 = vld [vmem:[%s2434_s1 + $0x40] sm:$0xff] }
  0x81   :  { %v344_v54 = vsel %vm343_vm5, %v340_v53, %v342_v52  ;;  %v345_v55 = vsel %vm343_vm5, %v342_v52, %v340_v53  ;;  %1933 = vmatpush1.msk.msra.mxu0 %vm75_vm2, %v253_v47  ;;  %v1400_v47 = vrot.slane %v1984_v34, %v2131_v11 }
  0x82   :  { %v359_v57 = vmul.f32 %v352_v43, %v345_v55  ;;  %v360_v58 = vmul.f32 %v356_v46, %v344_v54  ;;  %1934 = vmatmul.mubr.msk.f32.vlgmr.msra.gmra.mxu0 %vm71_vm4, %v2200_v51  ;;  %1942 = vmatprep.subr.msk.mxu0 %vm75_vm2, %v462_v50  ;;  %v1396_v46 = vrot.slane %v1984_v34, %v2129_v10 }
  0x83   :  { %1943 = vmatpush1.msk.msra.mxu0 %vm75_vm2, %v458_v29  ;;  %534 = vmatprep.mubr.f32.mxu0 %v2048_v2  ;;  %v994_v54 = vrot.slane %v989_v45, %v2129_v10 }
  0x84   :  { %v546_v63 = vpop.permute.xlu1 %545  ;;  %1937 = vmatprep.subr.msk.mxu1 %vm75_vm2, %v360_v58  ;;  %v544_v0 = vpop.permute.xlu0 %543  ;;  %v1974_v58 = vld [vmem:[%s2436_s3 + $0x2] ss:$8 sm:$0x3] }
  0x85   :  { %v548_v1 = vsel %vm547_vm6, %v544_v0, %v546_v63  ;;  %v549_v4 = vsel %vm547_vm6, %v546_v63, %v544_v0  ;;  %1938 = vmatpush1.msk.msra.mxu1 %vm75_vm2, %v359_v57  ;;  %v998_v57 = vrot.slane %v989_v45, %v2131_v11 }
  0x86   :  { %v563_v6 = vmul.f32 %v556_v56, %v548_v1  ;;  %v564_v7 = vmul.f32 %v560_v59, %v549_v4  ;;  %1939 = vmatmul.mubr.msk.f32.vlgmr.msra.gmra.mxu1 %vm71_vm4, %v2220_v61  ;;  %1944 = vmatmul.mubr.msk.f32.vlgmr.msra.gmra.mxu0 %vm71_vm4, %v2227_v62  ;;  %v1401_v59 = vcombine.low %v1396_v46, %v1400_v47 }
  0x87   :  { %640 = vmatprep.mubr.f32.mxu1 %v2048_v2  ;;  %746 = vmatprep.mubr.f32.mxu0 %v2048_v2  ;;  %v1196_v4 = vrot.slane %v1974_v58, %v2129_v10 }
  0x88   :  { %v652_v13 = vpop.permute.xlu1 %651  ;;  %1947 = vmatprep.subr.msk.mxu1 %vm75_vm2, %v564_v7  ;;  %v650_v15 = vpop.permute.xlu0 %649  ;;  %v1200_v7 = vrot.slane %v1974_v58, %v2131_v11  ;;  %v1403_v9 = vmul.f32 %v2106_v3, %v1401_v59 }
  0x89   :  { %v654_v16 = vsel %vm653_vm7, %v650_v15, %v652_v13  ;;  %v655_v17 = vsel %vm653_vm7, %v652_v13, %v650_v15  ;;  %1948 = vmatpush1.msk.msra.mxu1 %vm75_vm2, %v563_v6 }
  0x8a   :  { %v669_v18 = vmul.f32 %v662_v5, %v654_v16  ;;  %v670_v19 = vmul.f32 %v666_v8, %v655_v17  ;;  %1949 = vmatmul.mubr.msk.f32.vlgmr.msra.gmra.mxu1 %vm71_vm4, %v2249_v12  ;;  %v1979_v8 = vld [vmem:[%s2436_s3 + $0x3] ss:$8 sm:$0x3] }
  0x8b   :  { %852 = vmatprep.mubr.f32.mxu1 %v2048_v2  ;;  %v1303_v3 = vrot.slane %v1979_v8, %v2131_v11 }
  0x8c   :  { %v758_v24 = vpop.permute.xlu1 %757  ;;  %1952 = vmatprep.subr.msk.mxu0 %vm75_vm2, %v670_v19  ;;  %v756_v25 = vpop.permute.xlu0 %755 }
  0x8d   :  { %v760_v26 = vsel %vm759_vm8, %v756_v25, %v758_v24  ;;  %v761_v27 = vsel %vm759_vm8, %v758_v24, %v756_v25  ;;  %1953 = vmatpush1.msk.msra.mxu0 %vm75_vm2, %v669_v18  ;;  %v1299_v18 = vrot.slane %v1979_v8, %v2129_v10 }
  0x8e   :  { %v775_v28 = vmul.f32 %v768_v20, %v760_v26  ;;  %v776_v29 = vmul.f32 %v772_v21, %v761_v27  ;;  %1954 = vmatmul.mubr.msk.f32.vlgmr.msra.gmra.mxu0 %vm71_vm4, %v2269_v23  ;;  %v1989_v20 = vld [vmem:[%s2436_s3 + $0x5] ss:$8 sm:$0x3]  ;;  %v1406_v21 = vcombine.high %v1403_v9, %v1403_v9 }
  0x8f   :  { %958 = vmatprep.mubr.f32.mxu0 %v2048_v2  ;;  %v1498_v27 = vrot.slane %v1989_v20, %v2129_v10 }
  0x90   :  { %v864_v35 = vpop.permute.xlu1 %863  ;;  %1957 = vmatprep.subr.msk.mxu1 %vm75_vm2, %v776_v29  ;;  %v862_v36 = vpop.permute.xlu0 %861 }
  0x91   :  { %v866_v37 = vsel %vm865_vm9, %v862_v36, %v864_v35  ;;  %v867_v38 = vsel %vm865_vm9, %v864_v35, %v862_v36  ;;  %1958 = vmatpush1.msk.msra.mxu1 %vm75_vm2, %v775_v28 }
  0x92   :  { %v881_v43 = vmul.f32 %v874_v30, %v866_v37  ;;  %v882_v44 = vmul.f32 %v878_v31, %v867_v38  ;;  %1959 = vmatmul.mubr.msk.f32.vlgmr.msra.gmra.mxu1 %vm71_vm4, %v2289_v33  ;;  %v1994_v30 = vld [vmem:[%s2436_s3 + $0x6] ss:$8 sm:$0x3] }
  0x93   :  { %1098 = vmatprep.mubr.f32.mxu1 %v2048_v2  ;;  %v1605_v38 = vrot.slane %v1994_v30, %v2131_v11 }
  0x94   :  { %v1007_v49 = vpop.permute.xlu1 %1006  ;;  %1962 = vmatprep.subr.msk.mxu0 %vm75_vm2, %v882_v44  ;;  %v1005_v50 = vpop.permute.xlu0 %1004 }
  0x95   :  { %v1008_v52 = vsel %vm51_vm1, %v1005_v50, %v1007_v49  ;;  %v1009_v53 = vsel %vm51_vm1, %v1007_v49, %v1005_v50  ;;  %1963 = vmatpush1.msk.msra.mxu0 %vm75_vm2, %v881_v43  ;;  %v2004_v49 = vld [vmem:[%s2436_s3 + $0x10] ss:$8 sm:$0x3] }
  0x96   :  { %v1022_v55 = vmul.f32 %v1015_v41, %v1009_v53  ;;  %v1023_v56 = vmul.f32 %v1019_v42, %v1008_v52  ;;  %1964 = vmatmul.mubr.msk.f32.vlgmr.msra.gmra.mxu0 %vm71_vm4, %v2313_v48  ;;  %v1999_v41 = vld [vmem:[%s2436_s3 + $0x7] ss:$8 sm:$0x3]  ;;  %s2056_s3 = smov [#allocation2]  }
  0x97   :  { %1178 = vmatprep.mubr.f32.mxu0 %v2048_v2  ;;  %v1704_v46 = vrot.slane %v1999_v41, %v2129_v10  ;;  %v1708_v47 = vrot.slane %v1999_v41, %v2131_v11  ;;  %s1911_s27 = sshll.u32 %s2056_s3, 4  ;;  %s1912_s27 = int_to_ptr.vmem [resolvable:$true] %s1911_s27 }
  0x98   :  { %v986_v60 = vpop.permute.xlu1 %985  ;;  %1968 = vmatprep.subr.msk.mxu1 %vm75_vm2, %v1023_v56  ;;  %v984_v63 = vpop.permute.xlu0 %983  ;;  %v1807_v56 = vrot.slane %v2004_v49, %v2129_v10  ;;  %s2024_s28 = scalar_lea.vmem %s1912_s27, 512  ;;  %p2029_p1 = scmp.lt.s32.totalorder %s1912_s27, %s1912_s27 }
  0x99   :  { %v987_v0 = vsel %vm29_vm0, %v984_v63, %v986_v60  ;;  %v988_v1 = vsel %vm29_vm0, %v986_v60, %v984_v63  ;;  %1969 = vmatpush1.msk.msra.mxu1 %vm75_vm2, %v1022_v55  ;;  %p2025_p0 = scmp.ne.s32.totalorder %s1912_s27, %s2024_s28  ;;  %p2030_p2 = scmp.lt.s32.totalorder %s2024_s28, %s2024_s28 }
  0x9a   :  { %v1001_v5 = vmul.f32 %v994_v54, %v988_v1  ;;  %v1002_v6 = vmul.f32 %v998_v57, %v987_v0  ;;  %1970 = vmatmul.mubr.msk.f32.vlgmr.msra.gmra.mxu1 %vm71_vm4, %v2170_v39  ;;  %v1811_v57 = vrot.slane %v2004_v49, %v2131_v11 }
  0x9b   :  { %1279 = vmatprep.mubr.f32.mxu1 %v2048_v2  ;;  %p2031_p3 = por %p2030_p2, %p2029_p1 }
  0x9c   :  { %v1188_v13 = vpop.permute.xlu1 %1187  ;;  %1971 = vmatprep.subr.msk.mxu0 %vm75_vm2, %v1002_v6  ;;  %v1186_v15 = vpop.permute.xlu0 %1185 }
  0x9d   :  { %v1189_v16 = vsel %vm237_vm3, %v1186_v15, %v1188_v13  ;;  %v1190_v17 = vsel %vm237_vm3, %v1188_v13, %v1186_v15  ;;  %1972 = vmatpush1.msk.msra.mxu0 %vm75_vm2, %v1001_v5  ;;  %p2032_p4 = pnand %p2031_p3, %p2025_p0 }
  0x9e   :  { %v1203_v19 = vmul.f32 %v1196_v4, %v1190_v17  ;;  %v1204_v39 = vmul.f32 %v1200_v7, %v1189_v16  ;;  %1973 = vmatmul.mubr.msk.f32.vlgmr.msra.gmra.mxu0 %vm71_vm4, %v2175_v40  ;;  %v1502_v40 = vrot.slane %v1989_v20, %v2131_v11 }
  0x9f   :  { %1382 = vmatprep.mubr.f32.mxu0 %v2048_v2 }
  0xa0   :  { %v1291_v22 = vpop.permute.xlu1 %1290  ;;  %1976 = vmatprep.subr.msk.mxu1 %vm75_vm2, %v1204_v39  ;;  %v1289_v24 = vpop.permute.xlu0 %1288 }
  0xa1   :  { %v1292_v25 = vsel %vm343_vm5, %v1289_v24, %v1291_v22  ;;  %v1293_v26 = vsel %vm343_vm5, %v1291_v22, %v1289_v24  ;;  %1977 = vmatpush1.msk.msra.mxu1 %vm75_vm2, %v1203_v19 }
  0xa2   :  { %v1306_v28 = vmul.f32 %v1299_v18, %v1293_v26  ;;  %v1307_v29 = vmul.f32 %v1303_v3, %v1292_v25  ;;  %1978 = vmatmul.mubr.msk.f32.vlgmr.msra.gmra.mxu1 %vm71_vm4, %v2200_v51  ;;  %1986 = vmatprep.subr.msk.mxu1 %vm75_vm2, %v1406_v21  ;;  %v1601_v51 = vrot.slane %v1994_v30, %v2129_v10 }
  0xa3   :  { %1987 = vmatpush1.msk.msra.mxu1 %vm75_vm2, %v1403_v9  ;;  %1478 = vmatprep.mubr.f32.mxu1 %v2048_v2 }
  0xa4   :  { %v1490_v31 = vpop.permute.xlu1 %1489  ;;  %1981 = vmatprep.subr.msk.mxu0 %vm75_vm2, %v1307_v29  ;;  %v1488_v32 = vpop.permute.xlu0 %1487 }
  0xa5   :  { %v1491_v34 = vsel %vm547_vm6, %v1488_v32, %v1490_v31  ;;  %v1492_v35 = vsel %vm547_vm6, %v1490_v31, %v1488_v32  ;;  %1982 = vmatpush1.msk.msra.mxu0 %vm75_vm2, %v1306_v28 }
  0xa6   :  { %v1505_v36 = vmul.f32 %v1498_v27, %v1491_v34  ;;  %v1506_v37 = vmul.f32 %v1502_v40, %v1492_v35  ;;  %1983 = vmatmul.mubr.msk.f32.vlgmr.msra.gmra.mxu0 %vm71_vm4, %v2220_v61  ;;  %1988 = vmatmul.mubr.msk.f32.vlgmr.msra.gmra.mxu1 %vm71_vm4, %v2227_v62 }
  0xa7   :  { %1581 = vmatprep.mubr.f32.mxu0 %v2048_v2  ;;  %1684 = vmatprep.mubr.f32.mxu1 %v2048_v2 }
  0xa8   :  { %v1593_v42 = vpop.permute.xlu1 %1592  ;;  %1991 = vmatprep.subr.msk.mxu0 %vm75_vm2, %v1506_v37  ;;  %v1591_v43 = vpop.permute.xlu0 %1590 }
  0xa9   :  { %v1594_v44 = vsel %vm653_vm7, %v1591_v43, %v1593_v42  ;;  %v1595_v61 = vsel %vm653_vm7, %v1593_v42, %v1591_v43  ;;  %1992 = vmatpush1.msk.msra.mxu0 %vm75_vm2, %v1505_v36 }
  0xaa   :  { %v1608_v62 = vmul.f32 %v1601_v51, %v1594_v44  ;;  %v1609_v45 = vmul.f32 %v1605_v38, %v1595_v61  ;;  %1993 = vmatmul.mubr.msk.f32.vlgmr.msra.gmra.mxu0 %vm71_vm4, %v2249_v12 }
  0xab   :  { %1787 = vmatprep.mubr.f32.mxu0 %v2048_v2 }
  0xac   :  { %v1696_v50 = vpop.permute.xlu1 %1695  ;;  %1996 = vmatprep.subr.msk.mxu1 %vm75_vm2, %v1609_v45  ;;  %v1694_v52 = vpop.permute.xlu0 %1693 }
  0xad   :  { %v1697_v53 = vsel %vm759_vm8, %v1694_v52, %v1696_v50  ;;  %v1698_v54 = vsel %vm759_vm8, %v1696_v50, %v1694_v52  ;;  %1997 = vmatpush1.msk.msra.mxu1 %vm75_vm2, %v1608_v62 }
  0xae   :  { %v1711_v55 = vmul.f32 %v1704_v46, %v1697_v53  ;;  %v1712_v12 = vmul.f32 %v1708_v47, %v1698_v54  ;;  %1998 = vmatmul.mubr.msk.f32.vlgmr.msra.gmra.mxu1 %vm71_vm4, %v2269_v23 }
  0xaf   :  { %1890 = vmatprep.mubr.f32.mxu1 %v2048_v2 }
  0xb0   :  { %v1799_v58 = vpop.permute.xlu1 %1798  ;;  %2001 = vmatprep.subr.msk.mxu0 %vm75_vm2, %v1712_v12  ;;  %v1797_v59 = vpop.permute.xlu0 %1796 }
  0xb1   :  { %v1800_v60 = vsel %vm865_vm9, %v1797_v59, %v1799_v58  ;;  %v1801_v63 = vsel %vm865_vm9, %v1799_v58, %v1797_v59  ;;  %2002 = vmatpush1.msk.msra.mxu0 %vm75_vm2, %v1711_v55 }
  0xb2   :  { %v1814_v10 = vmul.f32 %v1807_v56, %v1800_v60  ;;  %v1815_v0 = vmul.f32 %v1811_v57, %v1801_v63  ;;  %2003 = vmatmul.mubr.msk.f32.vlgmr.msra.gmra.mxu0 %vm71_vm4, %v2289_v33 }
  0xb4   :  { %2006 = vmatprep.subr.msk.mxu1 %vm75_vm2, %v1815_v0 }
  0xb5   :  { %2007 = vmatpush1.msk.msra.mxu1 %vm75_vm2, %v1814_v10 }
  0xb6   :  { %2008 = vmatmul.mubr.msk.f32.vlgmr.msra.gmra.mxu1 %vm71_vm4, %v2313_v48 }
  0xbd   :  { %v970_v30 = vpop.permute.xlu0 %969 }
 0x13e   :  { %v148_v2 = vpop.f32.mrf.mxu0  ;;  %v228_v11 = vpop.f32.mrf.mxu1 }
 0x13f   :  { %v229_v23 = vadd.f32 %v228_v11, %v148_v2 }
 0x140   :  { %v150_v1 = vpop.f32.mrf.mxu0  ;;  %v230_v14 = vpop.f32.mrf.mxu1 }
 0x141   :  { %v231_v4 = vadd.f32 %v230_v14, %v150_v1 }
 0x142   :  { %v332_v5 = vpop.f32.mrf.mxu0 }
 0x143   :  { %v337_v6 = vadd.f32 %v332_v5, %v229_v23 }
 0x144   :  { %v334_v7 = vpop.f32.mrf.mxu0 }
 0x145   :  { %v338_v8 = vadd.f32 %v334_v7, %v231_v4 }
 0x146   :  { %v438_v9 = vpop.f32.mrf.mxu1  ;;  %v536_v13 = vpop.f32.mrf.mxu0 }
 0x147   :  { %v443_v33 = vadd.f32 %v438_v9, %v337_v6 }
 0x148   :  { %v440_v15 = vpop.f32.mrf.mxu1  ;;  %v538_v16 = vpop.f32.mrf.mxu0 }
 0x149   :  { %v444_v17 = vadd.f32 %v440_v15, %v338_v8  ;;  %v541_v18 = vadd.f32 %v536_v13, %v443_v33 }
 0x14a   :  { %v642_v19 = vpop.f32.mrf.mxu1 }
 0x14b   :  { %v542_v39 = vadd.f32 %v538_v16, %v444_v17  ;;  %v647_v48 = vadd.f32 %v642_v19, %v541_v18 }
 0x14c   :  { %v644_v3 = vpop.f32.mrf.mxu1 }
 0x14d   :  { %v648_v20 = vadd.f32 %v644_v3, %v542_v39 }
 0x14e   :  { %v748_v21 = vpop.f32.mrf.mxu0 }
 0x14f   :  { %v753_v22 = vadd.f32 %v748_v21, %v647_v48 }
 0x150   :  { %v750_v24 = vpop.f32.mrf.mxu0 }
 0x151   :  { %v754_v25 = vadd.f32 %v750_v24, %v648_v20 }
 0x152   :  { %v854_v26 = vpop.f32.mrf.mxu1 }
 0x153   :  { %v859_v27 = vadd.f32 %v854_v26, %v753_v22 }
 0x154   :  { %v856_v28 = vpop.f32.mrf.mxu1 }
 0x155   :  { %v860_v29 = vadd.f32 %v856_v28, %v754_v25 }
 0x156   :  { %v960_v40 = vpop.f32.mrf.mxu0 }
 0x157   :  { %v965_v31 = vadd.f32 %v960_v40, %v859_v27 }
 0x158   :  { %v962_v32 = vpop.f32.mrf.mxu0 }
 0x159   :  { %v966_v34 = vadd.f32 %v962_v32, %v860_v29  ;;  %v972_v35 = vadd.f32 %v970_v30, %v965_v31 }
 0x15a   :  { %v1100_v51 = vpop.f32.mrf.mxu1 }
 0x15b   :  { %v973_v36 = vadd.f32 %v970_v30, %v966_v34  ;;  %v974_v37 = vmax.f32 %v972_v35, 0.0 }
 0x15c   :  { %v1102_v41 = vpop.f32.mrf.mxu1 }
 0x15d   :  { %v975_v38 = vmax.f32 %v973_v36, 0.0  ;;  %976 = vst [vmem:[#allocation2] sm:$0xff] %v974_v37 }
 0x15e   :  { %v1180_v42 = vpop.f32.mrf.mxu0 }
 0x15f   :  { %v1181_v43 = vadd.f32 %v1180_v42, %v1100_v51  ;;  %977 = vst [vmem:[#allocation2 + $0x8] sm:$0xff] %v975_v38 }
 0x160   :  { %v1182_v44 = vpop.f32.mrf.mxu0 }
 0x161   :  { %v1183_v61 = vadd.f32 %v1182_v44, %v1102_v41 }
 0x162   :  { %v1281_v62 = vpop.f32.mrf.mxu1 }
 0x163   :  { %v1286_v45 = vadd.f32 %v1281_v62, %v1181_v43 }
 0x164   :  { %v1283_v46 = vpop.f32.mrf.mxu1 }
 0x165   :  { %v1287_v47 = vadd.f32 %v1283_v46, %v1183_v61 }
 0x166   :  { %v1384_v49 = vpop.f32.mrf.mxu0  ;;  %v1480_v50 = vpop.f32.mrf.mxu1 }
 0x167   :  { %v1389_v52 = vadd.f32 %v1384_v49, %v1286_v45 }
 0x168   :  { %v1386_v53 = vpop.f32.mrf.mxu0  ;;  %v1482_v12 = vpop.f32.mrf.mxu1 }
 0x169   :  { %v1390_v54 = vadd.f32 %v1386_v53, %v1287_v47  ;;  %v1485_v55 = vadd.f32 %v1480_v50, %v1389_v52 }
 0x16a   :  { %v1583_v56 = vpop.f32.mrf.mxu0 }
 0x16b   :  { %v1486_v57 = vadd.f32 %v1482_v12, %v1390_v54  ;;  %v1588_v58 = vadd.f32 %v1583_v56, %v1485_v55 }
 0x16c   :  { %v1585_v59 = vpop.f32.mrf.mxu0 }
 0x16d   :  { %v1589_v63 = vadd.f32 %v1585_v59, %v1486_v57 }
 0x16e   :  { %v1686_v60 = vpop.f32.mrf.mxu1 }
 0x16f   :  { %v1691_v10 = vadd.f32 %v1686_v60, %v1588_v58 }
 0x170   :  { %v1688_v0 = vpop.f32.mrf.mxu1 }
 0x171   :  { %v1692_v23 = vadd.f32 %v1688_v0, %v1589_v63 }
 0x172   :  { %v1789_v2 = vpop.f32.mrf.mxu0 }
 0x173   :  { %v1794_v1 = vadd.f32 %v1789_v2, %v1691_v10 }
 0x174   :  { %v1791_v11 = vpop.f32.mrf.mxu0 }
 0x175   :  { %v1795_v4 = vadd.f32 %v1791_v11, %v1692_v23 }
 0x176   :  { %v1892_v14 = vpop.f32.mrf.mxu1 }
 0x177   :  { %v1897_v5 = vadd.f32 %v1892_v14, %v1794_v1 }
 0x178   :  { %v1894_v6 = vpop.f32.mrf.mxu1 }
 0x179   :  { %v1899_v7 = vadd.f32 %v1897_v5, %v970_v30  ;;  %v1898_v8 = vadd.f32 %v1894_v6, %v1795_v4 }
 0x17b   :  { %v1901_v9 = vmax.f32 %v1899_v7, 0.0  ;;  %v1900_v13 = vadd.f32 %v1898_v8, %v970_v30 }
 0x17d   :  { %1904 = vst [vmem:[#allocation2 + $0x10] sm:$0xff] %v1901_v9  ;;  %v1902_v33 = vmax.f32 %v1900_v13, 0.0 }
 0x17f   :  { %1905 = vst [vmem:[#allocation2 + $0x18] sm:$0xff] %v1902_v33 }
 0x180   :  { %2035 = shalt.err (!%p2032_p4)
}
 0x181   :  { %s2057_s29 = smov 256  }
 0x182   :  { %1917 = dma.vmem_to_hbm [thread:$0]  %s1912_s27, 512, %s2437_s4, [#allocation3], %s2057_s29, %s2057_s29, %s2047_s18  }
 0x183   :  { %2044 = dma.done.wait [#allocation3], 512  }
 0x184   :  { %2045 = vsyncadd [#allocation3], 4294966784 }
 0x185   :  { %1921 = vsyncpa [#allocation3], 1 }

</bundles_post_ra>
